<compile_context>
chip_gen: v5e
topology: v5e:2x2
jax: 0.10.0
libtpu: 0.0.40
codegen_flags: <defaults>
</compile_context>

<pallas_src>
import functools

import jax
import jax.numpy as jnp
from jax import lax
from jax.experimental import pallas as pl
from jax.experimental.pallas import tpu as pltpu
import numpy as np

EPS = 1e-5
NC_PAD = 128  # lane-dense logits width for the head kernel


def _largest_tile(total, target, quantum=128):
    """Largest multiple of `quantum` that divides `total` and is <= target, else total."""
    best = total
    t = quantum
    while t <= min(total, target):
        if total % t == 0:
            best = t
        t += quantum
    return best if total % best == 0 else total


# ----------------------------------------------------------------------------
# Kernel 1: conv1 (Cin=1) + BN + ReLU  ->  conv2 + BN + ReLU
# grid = (B, L//TL); each step computes one (C, TL) output tile.
# ----------------------------------------------------------------------------
def _conv_block_kernel(xwin_ref, w1_ref, a1_ref, c1_ref, w2_ref, a2_ref, c2_ref,
                       out_ref, h1_ref, *, L, TL, K, C):
    # xwin_ref: (1, 1, 1, TL + 4P) zero-padded input window (halo = 2P each side)
    # w1_ref:   (C, K)             conv1 weights (in_channels == 1)
    # w2_ref:   (C, K*C)           conv2 weights reshaped for one im2col matmul
    # a*/c*:    (C, 1)             folded (BN scale) / (conv bias + BN shift)
    # out_ref:  (1, C, TL)         bf16 activation tile
    # h1_ref:   (C, TL + 2P)       VMEM scratch: layer-1 activation incl. halo
    P = K // 2
    TLe = TL + 2 * P
    l = pl.program_id(1)

    xrow = xwin_ref[0, 0]                            # (1, TL + 4P)
    w1 = w1_ref[...]                                 # (C, K)

    # conv1 taps accumulate in registers over the (C, TLe) tile
    h1 = w1[:, 0:1] * xrow[:, 0:TLe]
    for k in range(1, K):
        h1 = h1 + w1[:, k:k + 1] * xrow[:, k:k + TLe]
    h1 = jnp.maximum(h1 * a1_ref[...] + c1_ref[...], 0.0)   # bias+BN folded, ReLU

    # zero h1 outside the true sequence so conv2's 'same' zero padding is exact
    pos = l * TL - P + lax.broadcasted_iota(jnp.int32, (1, TLe), 1)
    h1 = jnp.where((pos >= 0) & (pos < L), h1, 0.0)
    h1_ref[...] = h1

    # conv2: one (C, K*C) @ (K*C, TL) MXU matmul on an im2col slab (f32 accumulate)
    slab = jnp.concatenate([h1_ref[:, k:k + TL] for k in range(K)], axis=0)
    h2 = jnp.dot(w2_ref[...], slab, preferred_element_type=jnp.float32)
    h2 = jnp.maximum(h2 * a2_ref[...] + c2_ref[...], 0.0)   # bias+BN folded, ReLU
    out_ref[0] = h2.astype(out_ref.dtype)


# ----------------------------------------------------------------------------
# Kernel 2: fc1 + BN + ReLU + fc2 + softmax, F-tiled reduction (grid = (F//TF,))
# fc1 weight streamed in its (H, F) layout (F lane-dense) and contracted on the
# last dim of both operands: acc(B,H) += x(B,TF) @ w(H,TF)^T on the MXU.
# ----------------------------------------------------------------------------
def _head_kernel(x_ref, w1_ref, afc_ref, cfc_ref, w2_ref, b2_ref, out_ref, acc_ref):
    f = pl.program_id(0)

    @pl.when(f == 0)
    def _():
        acc_ref[...] = jnp.zeros_like(acc_ref)

    # bf16 x bf16 matmul with f32 accumulation
    acc_ref[...] += lax.dot_general(
        x_ref[...], w1_ref[...],
        dimension_numbers=(((1,), (1,)), ((), ())),
        preferred_element_type=jnp.float32)

    @pl.when(f == pl.num_programs(0) - 1)
    def _():
        h = jnp.maximum(acc_ref[...] * afc_ref[...] + cfc_ref[...], 0.0)  # fc1 bias+BN folded
        logits = jnp.dot(h, w2_ref[...], preferred_element_type=jnp.float32) + b2_ref[...]
        m = jnp.max(logits, axis=1, keepdims=True)
        e = jnp.exp(logits - m)
        inv = pl.reciprocal(jnp.sum(e, axis=1, keepdims=True), approx=True)
        out_ref[...] = e * inv


# ----------------------------------------------------------------------------
# Wrapper
# ----------------------------------------------------------------------------
def cnn1d_forward(x, p, *, tl=None, tf=None):
    B, L = x.shape
    C, K = p["w1"].shape
    P = K // 2

    TL = tl if tl is not None else _largest_tile(L, 2048)
    assert L % TL == 0, "L must be divisible by the L-tile"
    nL = L // TL
    TLw = TL + 4 * P

    # Overlapping, zero-padded input windows (halo of 2P per side per tile).
    xpad = jnp.pad(x, ((0, 0), (2 * P, 2 * P)))
    xwin = jnp.stack([xpad[:, l * TL:l * TL + TLw] for l in range(nL)], axis=1)
    xwin = xwin.reshape(B, nL, 1, TLw)

    conv_kernel = functools.partial(_conv_block_kernel, L=L, TL=TL, K=K, C=C)
    conv_out = pl.pallas_call(
        conv_kernel,
        out_shape=jax.ShapeDtypeStruct((B, C, L), jnp.bfloat16),
        grid_spec=pltpu.PrefetchScalarGridSpec(
            num_scalar_prefetch=0,
            grid=(B, nL),
            in_specs=[
                pl.BlockSpec((1, 1, 1, TLw), lambda b, l: (b, l, 0, 0)),
                pl.BlockSpec((C, K), lambda b, l: (0, 0)),
                pl.BlockSpec((C, 1), lambda b, l: (0, 0)),
                pl.BlockSpec((C, 1), lambda b, l: (0, 0)),
                pl.BlockSpec((C, K * C), lambda b, l: (0, 0)),
                pl.BlockSpec((C, 1), lambda b, l: (0, 0)),
                pl.BlockSpec((C, 1), lambda b, l: (0, 0)),
            ],
            out_specs=pl.BlockSpec((1, C, TL), lambda b, l: (b, 0, l)),
            scratch_shapes=[pltpu.VMEM((C, TL + 2 * P), jnp.float32)],
        ),
        compiler_params=pltpu.CompilerParams(
            dimension_semantics=("parallel", "parallel")),
    )(xwin, p["w1"], p["a1"], p["c1"], p["w2m"], p["a2"], p["c2"])

    # Flatten (B, C, L) -> (B, C*L): identical ordering to torch.nn.Flatten on NCL.
    F = C * L
    x_flat = conv_out.reshape(B, F)
    H = p["wfc1"].shape[0]

    TF = tf if tf is not None else _largest_tile(F, 32768)
    assert F % TF == 0, "F must be divisible by the F-tile"
    nF = F // TF

    out_p = pl.pallas_call(
        _head_kernel,
        out_shape=jax.ShapeDtypeStruct((B, NC_PAD), jnp.float32),
        grid_spec=pltpu.PrefetchScalarGridSpec(
            num_scalar_prefetch=0,
            grid=(nF,),
            in_specs=[
                pl.BlockSpec((B, TF), lambda f: (0, f)),
                pl.BlockSpec((H, TF), lambda f: (0, f)),
                pl.BlockSpec((1, H), lambda f: (0, 0)),
                pl.BlockSpec((1, H), lambda f: (0, 0)),
                pl.BlockSpec((H, NC_PAD), lambda f: (0, 0)),
                pl.BlockSpec((1, NC_PAD), lambda f: (0, 0)),
            ],
            out_specs=pl.BlockSpec((B, NC_PAD), lambda f: (0, 0)),
            scratch_shapes=[pltpu.VMEM((B, H), jnp.float32)],
        ),
        compiler_params=pltpu.CompilerParams(dimension_semantics=("arbitrary",)),
    )(x_flat, p["wfc1"], p["afc"], p["cfc"], p["wfc2p"], p["bfc2p"])

    return out_p[:, :p["n_classes"]]


# ----------------------------------------------------------------------------
# Deterministic parameter init (PyTorch layouts in `raw`, kernel layouts in `p`)
# ----------------------------------------------------------------------------
def init_params(key, L, C, K, H, NC):
    ks = jax.random.split(key, 20)
    F = C * L
    raw = dict(
        w1_t=0.2 * jax.random.normal(ks[0], (C, 1, K), jnp.float32),
        b1=0.1 * jax.random.normal(ks[1], (C,), jnp.float32),
        g1=1.0 + 0.1 * jax.random.normal(ks[2], (C,), jnp.float32),
        be1=0.1 * jax.random.normal(ks[3], (C,), jnp.float32),
        m1=0.1 * jax.random.normal(ks[4], (C,), jnp.float32),
        v1=jax.random.uniform(ks[5], (C,), jnp.float32, 0.5, 1.5),
        w2_t=(0.2 / np.sqrt(C * K)) * jax.random.normal(ks[6], (C, C, K), jnp.float32),
        b2=0.1 * jax.random.normal(ks[7], (C,), jnp.float32),
        g2=1.0 + 0.1 * jax.random.normal(ks[8], (C,), jnp.float32),
        be2=0.1 * jax.random.normal(ks[9], (C,), jnp.float32),
        m2=0.1 * jax.random.normal(ks[10], (C,), jnp.float32),
        v2=jax.random.uniform(ks[11], (C,), jnp.float32, 0.5, 1.5),
        wfc1_t=(1.0 / np.sqrt(F)) * jax.random.normal(ks[12], (H, F), jnp.float32),
        bfc1=0.1 * jax.random.normal(ks[13], (H,), jnp.float32),
        gfc=1.0 + 0.1 * jax.random.normal(ks[14], (H,), jnp.float32),
        befc=0.1 * jax.random.normal(ks[15], (H,), jnp.float32),
        mfc=0.1 * jax.random.normal(ks[16], (H,), jnp.float32),
        vfc=jax.random.uniform(ks[17], (H,), jnp.float32, 0.5, 1.5),
        wfc2_t=(1.0 / np.sqrt(H)) * jax.random.normal(ks[18], (NC, H), jnp.float32),
        bfc2=0.1 * jax.random.normal(ks[19], (NC,), jnp.float32),
    )
    # Fold conv/fc bias + BN (eval mode) into a single scale (a) and shift (c).
    s1 = raw["g1"] / jnp.sqrt(raw["v1"] + EPS)
    s2 = raw["g2"] / jnp.sqrt(raw["v2"] + EPS)
    sfc = raw["gfc"] / jnp.sqrt(raw["vfc"] + EPS)
    # conv2 weights (C_out, C_in, K) -> (C_out, K*C_in) matching the im2col slab rows.
    w2m = jnp.transpose(raw["w2_t"], (0, 2, 1)).reshape(C, K * C)
    # Lane-dense padded fc2: extra logits get -1e30 bias -> exp()==0, softmax unaffected.
    wfc2p = jnp.zeros((H, NC_PAD), jnp.float32).at[:, :NC].set(raw["wfc2_t"].T)
    bfc2p = jnp.full((1, NC_PAD), -1e30, jnp.float32).at[0, :NC].set(raw["bfc2"])
    p = dict(
        n_classes=NC,
        w1=raw["w1_t"][:, 0, :],                              # (C, K)
        a1=s1.reshape(C, 1),
        c1=((raw["b1"] - raw["m1"]) * s1 + raw["be1"]).reshape(C, 1),
        w2m=w2m,                                              # (C, K*C)
        a2=s2.reshape(C, 1),
        c2=((raw["b2"] - raw["m2"]) * s2 + raw["be2"]).reshape(C, 1),
        wfc1=raw["wfc1_t"].astype(jnp.bfloat16),              # (H, F), F lane-dense, bf16
        afc=sfc.reshape(1, H),
        cfc=((raw["bfc1"] - raw["mfc"]) * sfc + raw["befc"]).reshape(1, H),
        wfc2p=wfc2p,                                          # (H, 128)
        bfc2p=bfc2p,                                          # (1, 128)
    )
    return raw, p


# ----------------------------------------------------------------------------
# Pure-JAX f32 reference (same eval-mode semantics) for correctness checking
# ----------------------------------------------------------------------------
def reference_forward(x, raw):
    def bn(h, g, b, m, v):
        return (h - m[None, :, None]) / jnp.sqrt(v[None, :, None] + EPS) \
            * g[None, :, None] + b[None, :, None]

    h = x[:, None, :]
    h = lax.conv_general_dilated(h, raw["w1_t"], (1,), "SAME",
                                 dimension_numbers=("NCH", "OIH", "NCH"))
    h = h + raw["b1"][None, :, None]
    h = jnp.maximum(bn(h, raw["g1"], raw["be1"], raw["m1"], raw["v1"]), 0.0)
    h = lax.conv_general_dilated(h, raw["w2_t"], (1,), "SAME",
                                 dimension_numbers=("NCH", "OIH", "NCH"))
    h = h + raw["b2"][None, :, None]
    h = jnp.maximum(bn(h, raw["g2"], raw["be2"], raw["m2"], raw["v2"]), 0.0)
    f = h.reshape(h.shape[0], -1)
    z = f @ raw["wfc1_t"].T + raw["bfc1"]
    z = (z - raw["mfc"]) / jnp.sqrt(raw["vfc"] + EPS) * raw["gfc"] + raw["befc"]
    z = jnp.maximum(z, 0.0)
    z = z @ raw["wfc2_t"].T + raw["bfc2"]
    return jax.nn.softmax(z, axis=1)


if __name__ == "__main__":
    # Small synthetic configuration (input_shape=256 instead of 144000) chosen so the
    # conv kernel runs 2 L-tiles and the head runs 4 F-tiles (exercises halo + reduction).
    B, L, C, K, H, NC = 4, 256, 32, 5, 32, 6
    key = jax.random.PRNGKey(0)
    kx, kp = jax.random.split(key)
    x = jax.random.normal(kx, (B, L), jnp.float32)
    raw, p = init_params(kp, L, C, K, H, NC)

    out = jax.block_until_ready(cnn1d_forward(x, p, tl=128, tf=2048))
    ref = jax.block_until_ready(reference_forward(x, raw))

    assert out.shape == (B, NC)
    assert np.all(np.isfinite(np.asarray(out)))
    # Tolerance accounts for bf16 activation/fc1-weight streaming and approx reciprocal.
    np.testing.assert_allclose(np.asarray(out), np.asarray(ref), rtol=2e-2, atol=2e-2)
    print("KERNEL_OK")
</pallas_src>

<mosaic_0001>
module attributes {stable_mosaic.version = 11 : i64} {
  func.func @_conv_block_kernel(%arg0: i32, %arg1: i32, %arg2: memref<1x1x1x136xf32, #tpu.memory_space<vmem>>, %arg3: memref<32x5xf32, #tpu.memory_space<vmem>>, %arg4: memref<32x1xf32, #tpu.memory_space<vmem>>, %arg5: memref<32x1xf32, #tpu.memory_space<vmem>>, %arg6: memref<32x160xf32, #tpu.memory_space<vmem>>, %arg7: memref<32x1xf32, #tpu.memory_space<vmem>>, %arg8: memref<32x1xf32, #tpu.memory_space<vmem>>, %arg9: memref<1x32x128xbf16, #tpu.memory_space<vmem>>, %arg10: memref<32x132xf32, #tpu.memory_space<vmem>>) attributes {dimension_semantics = [#tpu.dimension_semantics<parallel>, #tpu.dimension_semantics<parallel>], iteration_bounds = array<i64: 4, 2>, scalar_prefetch = 0 : i64, scratch_operands = 1 : i64, tpu.core_type = #tpu.core_type<tc>, window_params = [{transform_indices = @transform_0, window_bounds = array<i64: 1, 1, 1, 136>}, {pipeline_mode = #tpu.pipeline_mode<synchronous>, transform_indices = @transform_1, window_bounds = array<i64: 32, 5>}, {pipeline_mode = #tpu.pipeline_mode<synchronous>, transform_indices = @transform_2, window_bounds = array<i64: 32, 1>}, {pipeline_mode = #tpu.pipeline_mode<synchronous>, transform_indices = @transform_3, window_bounds = array<i64: 32, 1>}, {pipeline_mode = #tpu.pipeline_mode<synchronous>, transform_indices = @transform_4, window_bounds = array<i64: 32, 160>}, {pipeline_mode = #tpu.pipeline_mode<synchronous>, transform_indices = @transform_5, window_bounds = array<i64: 32, 1>}, {pipeline_mode = #tpu.pipeline_mode<synchronous>, transform_indices = @transform_6, window_bounds = array<i64: 32, 1>}, {transform_indices = @transform_7, window_bounds = array<i64: 1, 32, 128>}]} {
    %c0 = arith.constant 0 : index
    %c0_0 = arith.constant 0 : index
    %c0_1 = arith.constant 0 : index
    %c0_2 = arith.constant 0 : index
    %0 = vector.load %arg2[%c0, %c0_0, %c0_1, %c0_2] : memref<1x1x1x136xf32, #tpu.memory_space<vmem>>, vector<1x1x1x136xf32>
    %1 = vector.shape_cast %0 : vector<1x1x1x136xf32> to vector<1x136xf32>
    %c0_3 = arith.constant 0 : index
    %c0_4 = arith.constant 0 : index
    %2 = vector.load %arg3[%c0_3, %c0_4] : memref<32x5xf32, #tpu.memory_space<vmem>>, vector<32x5xf32>
    %3 = vector.extract_strided_slice %2 {offsets = [0, 0], sizes = [32, 1], strides = [1, 1]} : vector<32x5xf32> to vector<32x1xf32>
    %4 = vector.extract_strided_slice %1 {offsets = [0, 0], sizes = [1, 132], strides = [1, 1]} : vector<1x136xf32> to vector<1x132xf32>
    %5 = vector.broadcast %3 : vector<32x1xf32> to vector<32x132xf32>
    %6 = vector.broadcast %4 : vector<1x132xf32> to vector<32x132xf32>
    %7 = arith.mulf %5, %6 : vector<32x132xf32>
    %8 = vector.extract_strided_slice %2 {offsets = [0, 1], sizes = [32, 1], strides = [1, 1]} : vector<32x5xf32> to vector<32x1xf32>
    %9 = vector.extract_strided_slice %1 {offsets = [0, 1], sizes = [1, 132], strides = [1, 1]} : vector<1x136xf32> to vector<1x132xf32>
    %10 = vector.broadcast %8 : vector<32x1xf32> to vector<32x132xf32>
    %11 = vector.broadcast %9 : vector<1x132xf32> to vector<32x132xf32>
    %12 = arith.mulf %10, %11 : vector<32x132xf32>
    %13 = arith.addf %7, %12 : vector<32x132xf32>
    %14 = vector.extract_strided_slice %2 {offsets = [0, 2], sizes = [32, 1], strides = [1, 1]} : vector<32x5xf32> to vector<32x1xf32>
    %15 = vector.extract_strided_slice %1 {offsets = [0, 2], sizes = [1, 132], strides = [1, 1]} : vector<1x136xf32> to vector<1x132xf32>
    %16 = vector.broadcast %14 : vector<32x1xf32> to vector<32x132xf32>
    %17 = vector.broadcast %15 : vector<1x132xf32> to vector<32x132xf32>
    %18 = arith.mulf %16, %17 : vector<32x132xf32>
    %19 = arith.addf %13, %18 : vector<32x132xf32>
    %20 = vector.extract_strided_slice %2 {offsets = [0, 3], sizes = [32, 1], strides = [1, 1]} : vector<32x5xf32> to vector<32x1xf32>
    %21 = vector.extract_strided_slice %1 {offsets = [0, 3], sizes = [1, 132], strides = [1, 1]} : vector<1x136xf32> to vector<1x132xf32>
    %22 = vector.broadcast %20 : vector<32x1xf32> to vector<32x132xf32>
    %23 = vector.broadcast %21 : vector<1x132xf32> to vector<32x132xf32>
    %24 = arith.mulf %22, %23 : vector<32x132xf32>
    %25 = arith.addf %19, %24 : vector<32x132xf32>
    %26 = vector.extract_strided_slice %2 {offsets = [0, 4], sizes = [32, 1], strides = [1, 1]} : vector<32x5xf32> to vector<32x1xf32>
    %27 = vector.extract_strided_slice %1 {offsets = [0, 4], sizes = [1, 132], strides = [1, 1]} : vector<1x136xf32> to vector<1x132xf32>
    %28 = vector.broadcast %26 : vector<32x1xf32> to vector<32x132xf32>
    %29 = vector.broadcast %27 : vector<1x132xf32> to vector<32x132xf32>
    %30 = arith.mulf %28, %29 : vector<32x132xf32>
    %31 = arith.addf %25, %30 : vector<32x132xf32>
    %c0_5 = arith.constant 0 : index
    %c0_6 = arith.constant 0 : index
    %32 = vector.load %arg4[%c0_5, %c0_6] : memref<32x1xf32, #tpu.memory_space<vmem>>, vector<32x1xf32>
    %33 = vector.broadcast %32 : vector<32x1xf32> to vector<32x132xf32>
    %34 = arith.mulf %31, %33 : vector<32x132xf32>
    %c0_7 = arith.constant 0 : index
    %c0_8 = arith.constant 0 : index
    %35 = vector.load %arg5[%c0_7, %c0_8] : memref<32x1xf32, #tpu.memory_space<vmem>>, vector<32x1xf32>
    %36 = vector.broadcast %35 : vector<32x1xf32> to vector<32x132xf32>
    %37 = arith.addf %34, %36 : vector<32x132xf32>
    %cst = arith.constant 0.000000e+00 : f32
    %38 = vector.broadcast %cst : f32 to vector<32x132xf32>
    %39 = arith.maximumf %37, %38 : vector<32x132xf32>
    %c128_i32 = arith.constant 128 : i32
    %40 = arith.muli %arg1, %c128_i32 : i32
    %c2_i32 = arith.constant 2 : i32
    %41 = arith.subi %40, %c2_i32 : i32
    %42 = tpu.iota {dimensions = array<i32: 1>} : vector<1x132xi32>
    %43 = vector.broadcast %41 : i32 to vector<1x132xi32>
    %44 = arith.addi %43, %42 : vector<1x132xi32>
    %c0_i32 = arith.constant 0 : i32
    %45 = vector.broadcast %c0_i32 : i32 to vector<1x132xi32>
    %46 = arith.cmpi sge, %44, %45 : vector<1x132xi32>
    %c256_i32 = arith.constant 256 : i32
    %47 = vector.broadcast %c256_i32 : i32 to vector<1x132xi32>
    %48 = arith.cmpi slt, %44, %47 : vector<1x132xi32>
    %49 = arith.andi %46, %48 : vector<1x132xi1>
    %cst_9 = arith.constant 0.000000e+00 : f32
    %50 = vector.shape_cast %49 : vector<1x132xi1> to vector<1x132xi1>
    %51 = vector.broadcast %50 : vector<1x132xi1> to vector<32x132xi1>
    %52 = vector.broadcast %cst_9 : f32 to vector<32x132xf32>
    %53 = arith.select %51, %39, %52 : vector<32x132xi1>, vector<32x132xf32>
    %c0_10 = arith.constant 0 : index
    %c0_11 = arith.constant 0 : index
    %54 = vector.load %arg10[%c0_10, %c0_11] : memref<32x132xf32, #tpu.memory_space<vmem>>, vector<32x132xf32>
    tpu.vector_store %arg10[%c0_10, %c0_11], %53 {strides = array<i32>} : memref<32x132xf32, #tpu.memory_space<vmem>>, vector<32x132xf32>,
    %c0_12 = arith.constant 0 : index
    %c0_13 = arith.constant 0 : index
    %55 = vector.load %arg10[%c0_12, %c0_13] : memref<32x132xf32, #tpu.memory_space<vmem>>, vector<32x128xf32>
    %c0_14 = arith.constant 0 : index
    %c1 = arith.constant 1 : index
    %56 = vector.load %arg10[%c0_14, %c1] : memref<32x132xf32, #tpu.memory_space<vmem>>, vector<32x128xf32>
    %c0_15 = arith.constant 0 : index
    %c2 = arith.constant 2 : index
    %57 = vector.load %arg10[%c0_15, %c2] : memref<32x132xf32, #tpu.memory_space<vmem>>, vector<32x128xf32>
    %c0_16 = arith.constant 0 : index
    %c3 = arith.constant 3 : index
    %58 = vector.load %arg10[%c0_16, %c3] : memref<32x132xf32, #tpu.memory_space<vmem>>, vector<32x128xf32>
    %c0_17 = arith.constant 0 : index
    %c4 = arith.constant 4 : index
    %59 = vector.load %arg10[%c0_17, %c4] : memref<32x132xf32, #tpu.memory_space<vmem>>, vector<32x128xf32>
    %60 = tpu.concatenate %55, %56, %57, %58, %59 in 0 : vector<32x128xf32>, vector<32x128xf32>, vector<32x128xf32>, vector<32x128xf32>, vector<32x128xf32> -> vector<160x128xf32>
    %c0_18 = arith.constant 0 : index
    %c0_19 = arith.constant 0 : index
    %61 = vector.load %arg6[%c0_18, %c0_19] : memref<32x160xf32, #tpu.memory_space<vmem>>, vector<32x160xf32>
    %cst_20 = arith.constant dense<0.000000e+00> : vector<32x128xf32>
    %62 = tpu.matmul %61, %60, %cst_20 {dimension_numbers = #tpu.dot_dimension_numbers<[1], [0], [0], [1], [0, 0, 1, 1], [], []>} : vector<32x160xf32>, vector<160x128xf32>, vector<32x128xf32> -> vector<32x128xf32>
    %c0_21 = arith.constant 0 : index
    %c0_22 = arith.constant 0 : index
    %63 = vector.load %arg7[%c0_21, %c0_22] : memref<32x1xf32, #tpu.memory_space<vmem>>, vector<32x1xf32>
    %64 = vector.broadcast %63 : vector<32x1xf32> to vector<32x128xf32>
    %65 = arith.mulf %62, %64 : vector<32x128xf32>
    %c0_23 = arith.constant 0 : index
    %c0_24 = arith.constant 0 : index
    %66 = vector.load %arg8[%c0_23, %c0_24] : memref<32x1xf32, #tpu.memory_space<vmem>>, vector<32x1xf32>
    %67 = vector.broadcast %66 : vector<32x1xf32> to vector<32x128xf32>
    %68 = arith.addf %65, %67 : vector<32x128xf32>
    %cst_25 = arith.constant 0.000000e+00 : f32
    %69 = vector.broadcast %cst_25 : f32 to vector<32x128xf32>
    %70 = arith.maximumf %68, %69 : vector<32x128xf32>
    %71 = arith.truncf %70 : vector<32x128xf32> to vector<32x128xbf16>
    %c0_26 = arith.constant 0 : index
    %c0_27 = arith.constant 0 : index
    %c0_28 = arith.constant 0 : index
    %72 = vector.load %arg9[%c0_26, %c0_27, %c0_28] : memref<1x32x128xbf16, #tpu.memory_space<vmem>>, vector<1x32x128xbf16>
    %73 = vector.shape_cast %72 : vector<1x32x128xbf16> to vector<32x128xbf16>
    %74 = vector.shape_cast %71 : vector<32x128xbf16> to vector<1x32x128xbf16>
    tpu.vector_store %arg9[%c0_26, %c0_27, %c0_28], %74 {strides = array<i32>} : memref<1x32x128xbf16, #tpu.memory_space<vmem>>, vector<1x32x128xbf16>,
    return
  }
  func.func @transform_0(%arg0: i32, %arg1: i32) -> (i32, i32, i32, i32) {
    %c0_i32 = arith.constant 0 : i32
    %c0_i32_0 = arith.constant 0 : i32
    %c0_i32_1 = arith.constant 0 : i32
    return %arg0, %arg1, %c0_i32, %c0_i32_0 : i32, i32, i32, i32
  }
  func.func @transform_1(%arg0: i32, %arg1: i32) -> (i32, i32) {
    %c0_i32 = arith.constant 0 : i32
    %c0_i32_0 = arith.constant 0 : i32
    %c0_i32_1 = arith.constant 0 : i32
    return %c0_i32, %c0_i32_0 : i32, i32
  }
  func.func @transform_2(%arg0: i32, %arg1: i32) -> (i32, i32) {
    %c0_i32 = arith.constant 0 : i32
    %c0_i32_0 = arith.constant 0 : i32
    %c0_i32_1 = arith.constant 0 : i32
    return %c0_i32, %c0_i32_0 : i32, i32
  }
  func.func @transform_3(%arg0: i32, %arg1: i32) -> (i32, i32) {
    %c0_i32 = arith.constant 0 : i32
    %c0_i32_0 = arith.constant 0 : i32
    %c0_i32_1 = arith.constant 0 : i32
    return %c0_i32, %c0_i32_0 : i32, i32
  }
  func.func @transform_4(%arg0: i32, %arg1: i32) -> (i32, i32) {
    %c0_i32 = arith.constant 0 : i32
    %c0_i32_0 = arith.constant 0 : i32
    %c0_i32_1 = arith.constant 0 : i32
    return %c0_i32, %c0_i32_0 : i32, i32
  }
  func.func @transform_5(%arg0: i32, %arg1: i32) -> (i32, i32) {
    %c0_i32 = arith.constant 0 : i32
    %c0_i32_0 = arith.constant 0 : i32
    %c0_i32_1 = arith.constant 0 : i32
    return %c0_i32, %c0_i32_0 : i32, i32
  }
  func.func @transform_6(%arg0: i32, %arg1: i32) -> (i32, i32) {
    %c0_i32 = arith.constant 0 : i32
    %c0_i32_0 = arith.constant 0 : i32
    %c0_i32_1 = arith.constant 0 : i32
    return %c0_i32, %c0_i32_0 : i32, i32
  }
  func.func @transform_7(%arg0: i32, %arg1: i32) -> (i32, i32, i32) {
    %c0_i32 = arith.constant 0 : i32
    %c0_i32_0 = arith.constant 0 : i32
    return %arg0, %c0_i32, %arg1 : i32, i32, i32
  }
}

</mosaic_0001>

<bundles_post_ra>
// kernel: tpu_custom_call.1
= control target key start
LH: loop header
LB: loop body
LE: loop exit
PB: predicated region body
PF: predicated region fallthrough
CT: control target
= control target key end

     0   :  { %s1934_s0 = inlined_call_operand.vmem [shape: f32[4,2,1,136], index: 0, kind: input, shape index: {}]   ;;  %s1935_s1 = inlined_call_operand.vmem [shape: f32[32,5], index: 1, kind: input, shape index: {}]   ;;  %s1936_s2 = inlined_call_operand.vmem [shape: f32[32,1], index: 2, kind: input, shape index: {}]   ;;  %s1937_s3 = inlined_call_operand.vmem [shape: f32[32,1], index: 3, kind: input, shape index: {}]   ;;  %s1938_s4 = inlined_call_operand.vmem [shape: f32[32,160], index: 4, kind: input, shape index: {}]   ;;  %s1939_s5 = inlined_call_operand.vmem [shape: f32[32,1], index: 5, kind: input, shape index: {}]   ;;  %s1940_s6 = inlined_call_operand.vmem [shape: f32[32,1], index: 6, kind: input, shape index: {}]   ;;  %s1941_s7 = inlined_call_operand.hbm [shape: bf16[4,32,256], index: 7, kind: output, shape index: {}]  }
   0x1   :  { %1944 = sst [smem:[#allocation6_spill]] %s1934_s0 }
   0x2   :  { %12 = vsyncpa [#allocation4], 0 }
   0x3   :  { %14 = vsyncpa [#allocation4 + $0x1], 0  ;;  %s1479_s24 = smov 0   ;;  %s1481_s25 = smov 0  }
   0x4   :  { %s1483_s26 = smov 0   ;;  %s1485_s27 = smov 0  }
   0x5   :  { %s1487_s28 = smov 0   ;;  %s1489_s29 = smov 0  }
   0x6   :  { %s1491_s30 = smov 0   ;;  %s1493_s8 = smov 0  }
   0x7 LB: > { %s1080_s9 = sadd.s32 4294967295, %s1425_s8   ;;  %s1081_s10 = sadd.s32 4294967294, %s1425_s8   ;;  %s1425_s8 = sphi %s1493_s8, %s20_s8   ;;  %s1421_s30 = sphi %s1491_s30, %s1959_s30   ;;  %s1417_s29 = sphi %s1489_s29, %s1958_s29   ;;  %s1413_s28 = sphi %s1487_s28, %s1957_s28   ;;  %s1409_s27 = sphi %s1485_s27, %s1956_s27   ;;  %s1405_s26 = sphi %s1483_s26, %s1955_s26   ;;  %s1401_s25 = sphi %s1481_s25, %s1954_s25   ;;  %s1397_s24 = sphi %s1479_s24, %s1953_s24  }
   0x8   : > { %s29_s11 = sadd.s32 1, %s1417_s29  ;;  %s32_s12 = sadd.s32 1, %s1421_s30 }
   0x9   : > { %p30_p0 = scmp.ge.s32.totalorder %s29_s11, 2  ;;  %p205_p1 = scmp.ne.s32.totalorder %s1405_s26, %s1401_s25 }
   0xa   : > { %p206_p2 = scmp.eq.s32.totalorder %s1080_s9, 7  ;;  %p211_p5 = scmp.ne.s32.totalorder %s1401_s25, %s1397_s24 }
   0xb   : > { %s1961_s11 = smov (%p30_p0, %s29_s11), 0  ;;  %s1963_s12 = smov (!%p30_p0, %s32_s12), %s1421_s30 }
   0xc   : > { %s191_s13 = ssub.s32 %s1417_s29, %s1961_s11  ;;  %p1530_p3 = por %p206_p2, %p205_p1 }
   0xd   : > { %p34_p4 = scmp.ge.s32.totalorder %s1963_s12, 4  ;;  %p212_p6 = scmp.eq.s32.totalorder %s1081_s10, 7 }
   0xe   : > { %p1084_p7 = scmp.ge.s32.totalorder %s1425_s8, 1  ;;  %p259_p9 = scmp.lt.s32.totalorder %s1425_s8, 9 }
   0xf   : > { %s1965_s12 = smov (%p34_p4, %s1963_s12), 0  ;;  %p1539_p8 = por %p212_p6, %p211_p5 }
  0x10   : > { %s190_s16 = ssub.s32 %s1421_s30, %s1965_s12  ;;  %s195_s17 = sadd.s32 1, %s1405_s26 }
  0x11   : > { %s192_s18 = sor.u32 %s191_s13, %s190_s16  ;;  %p260_p10 = pnand %p1084_p7, %p259_p9 }
  0x12   : > { %p193_p11 = scmp.eq.s32.totalorder %s192_s18, 0  ;;  %p294_p12 = scmp.lt.s32.totalorder (!%p260_p10), %s1413_s28, 3 }
  0x13   : > { %263 = sbr.rel (%p260_p10) target bundleno = 697 (0x2b9), region = 48  ;;  %p296_p13 = scmp.lt.s32.totalorder (!%p260_p10), %s1409_s27, 1 }
  0x14   : > { %s1548_s19 = scalar_select %p193_p11, %s1405_s26, %s195_s17  }
  0x15   : > { %s1947_s0 = sld [smem:[#allocation6_spill]] (!%p260_p10)  ;;  %s1942_s13 = smov (!%p260_p10), 127  }
  0x16   : > { %s1433_s16 = smov (!%p260_p10), 126   ;;  %s1952_s9 = smov (!%p260_p10), 127  }
  0x18   : > { %v305_v0 = vld [vmem:[%s1935_s1 + $0x10] sm:$0xff]  ;;  %v303_v1 = vld [vmem:[%s1935_s1] sm:$0xff]  ;;  %v1427_v2 = vmov 1   ;;  %v1428_v3 = vmov 0   ;;  %v306_v4 = vld [vmem:[%s1935_s1 + $0x18] sm:$0xff]  ;;  %v1429_v6 = vmov 2  }
  0x19   : > { %1227 = vset.pattern.permute.xlu0 %v1427_v2  ;;  %1226 = vset.pattern.permute.xlu2 %v1427_v2  ;;  %v304_v5 = vld [vmem:[%s1935_s1 + $0x8] sm:$0xff]  ;;  %v1430_v7 = vmov 4   ;;  %v1431_v8 = vmov 3   ;;  %s295_s17 = scalar_select %p294_p12, %s1413_s28, 3  ;;  %v619_v57 = vld [vmem:[%s1936_s2 + $0x18] sm:$0xff]  ;;  %v618_v63 = vld [vmem:[%s1936_s2 + $0x10] sm:$0xff] }
  0x1a   : > { %1225 = vset.pattern.permute.xlu1 %v1428_v3  ;;  %349 = vperm.xlu0 %1227, %v305_v0   ;;  %s297_s18 = scalar_select %p296_p13, %s1409_s27, 1  ;;  %vm388_vm0 = vcmask 1039360   ;;  %vm457_vm1 = vcmask 1031168   ;;  %vm526_vm2 = vcmask 1022976   ;;  %vm595_vm3 = vcmask 1014784  }
  0x1b   : > { %319 = vperm.xlu1 %1225, %v305_v0   ;;  %341 = vperm.xlu2 %1226, %v303_v1   ;;  %s1087_s21 = sshll.u32 %s295_s17, 2  ;;  %s1434_s17 = smov 125   ;;  %vm715_vm7 = vcmask 31744   ;;  %vm843_vm11 = vcmask 261120  }
  0x1c   : > { %s1086_s20 = sshll.u32 %s297_s18, 1  ;;  %s1435_s18 = smov 124  }
  0x1d   : > { %s300_s22 = sadd.s32 %s1087_s21, %s1086_s20 }
  0x1e   : > { %s301_s10 = scalar_lea.vmem %s1947_s0, %s300_s22 }
  0x1f   : > { %v302_v9 = vld [vmem:[%s301_s10] sm:$0x3] }
  0x20   : > { %v1569_v10 = vperm.slane %v302_v9, 0  ;;  %v1571_v11 = vperm.slane %v302_v9, 1 }
  0x22   : > { %1230 = vset.pattern.permute.xlu0 %v1429_v6 }
  0x23   : > { %324 = vperm.xlu1 %1225, %v306_v4   ;;  %345 = vperm.xlu2 %1226, %v304_v5  }
  0x24   : > { %414 = vperm.xlu0 %1230, %v304_v5  }
  0x2b   : > { %1228 = vset.pattern.permute.xlu1 %v1427_v2  ;;  %1229 = vset.pattern.permute.xlu2 %v1429_v6  ;;  %v651_v2 = vld [vmem:[%s1937_s3 + $0x18] sm:$0xff] }
  0x2c   : > { %353 = vperm.xlu1 %1228, %v306_v4   ;;  %410 = vperm.xlu2 %1229, %v303_v1  }
  0x2d   : > { %1234 = vset.pattern.permute.xlu0 %v1430_v7 }
  0x2e   : > { %560 = vperm.xlu0 %1234, %v306_v4  }
  0x34   : > { %1231 = vset.pattern.permute.xlu1 %v1429_v6  ;;  %418 = vperm.xlu2 %1229, %v305_v0   ;;  %v650_v6 = vld [vmem:[%s1937_s3 + $0x10] sm:$0xff] }
  0x35   : > { %422 = vperm.xlu1 %1231, %v306_v4  }
  0x36   : > { %548 = vperm.xlu0 %1234, %v303_v1  }
  0x3c   : > { %1233 = vset.pattern.permute.xlu2 %v1431_v8 }
  0x3d   : > { %1232 = vset.pattern.permute.xlu1 %v1431_v8  ;;  %487 = vperm.xlu2 %1233, %v305_v0  }
  0x3e   : > { %491 = vperm.xlu1 %1232, %v306_v4   ;;  %1236 = vset.pattern.permute.xlu0 %v1428_v3 }
  0x3f   : > { %309 = vperm.xlu0 %1236, %v303_v1  }
  0x45   : > { %1235 = vset.pattern.permute.xlu2 %v1430_v7 }
  0x46   : > { %483 = vperm.xlu1 %1232, %v304_v5   ;;  %556 = vperm.xlu2 %1235, %v305_v0  }
  0x47   : > { %314 = vperm.xlu0 %1236, %v304_v5  }
  0x4e   : > { %479 = vperm.xlu1 %1232, %v303_v1   ;;  %552 = vperm.xlu2 %1235, %v304_v5  }
  0x56   : > { %1237 = vset.pattern.permute.xlu1 %v1428_v3  ;;  %1238 = vset.pattern.permute.xlu2 %v1428_v3 }
  0x75   : > { %v342_v12 = vpop.permute.xlu2 %341 }
  0x76   : > { %v356_v13 = vmul.f32 %v342_v12, %v1569_v10  ;;  %v357_v14 = vmul.f32 %v342_v12, %v1571_v11 }
  0x78   : > { %374 = vrot.lane.b32.xlu1 %v357_v14, %s1942_s13  ;;  %372 = vrot.lane.b32.xlu2 %v356_v13, %s1942_s13 }
  0x7d   : > { %v346_v15 = vpop.permute.xlu2 %345 }
  0x7e   : > { %v358_v16 = vmul.f32 %v346_v15, %v1569_v10  ;;  %v359_v17 = vmul.f32 %v346_v15, %v1571_v11 }
  0x80   : > { %378 = vrot.lane.b32.xlu0 %v359_v17, %s1942_s13  ;;  %376 = vrot.lane.b32.xlu2 %v358_v16, %s1942_s13 }
  0x86   : > { %v411_v23 = vpop.permute.xlu2 %410 }
  0x87   : > { %v425_v47 = vmul.f32 %v411_v23, %v1569_v10  ;;  %v426_v48 = vmul.f32 %v411_v23, %v1571_v11 }
  0x8c   : > { %v350_v18 = vpop.permute.xlu0 %349 }
  0x8d   : > { %v360_v19 = vmul.f32 %v350_v18, %v1569_v10  ;;  %v361_v20 = vmul.f32 %v350_v18, %v1571_v11  ;;  %v1583_v21 = vpop.permute.xlu1 %319  ;;  %v648_v18 = vld [vmem:[%s1937_s3] sm:$0xff] }
  0x8e   : > { %v419_v27 = vpop.permute.xlu2 %418  ;;  %v337_v3 = vmul.f32 %v1571_v11, %v1583_v21 }
  0x8f   : > { %380 = vrot.lane.b32.xlu1 %v360_v19, %s1942_s13  ;;  %382 = vrot.lane.b32.xlu2 %v361_v20, %s1942_s13  ;;  %v429_v28 = vmul.f32 %v419_v27, %v1569_v10  ;;  %v430_v32 = vmul.f32 %v419_v27, %v1571_v11  ;;  %v617_v19 = vld [vmem:[%s1936_s2 + $0x8] sm:$0xff]  ;;  %v336_v27 = vmul.f32 %v1569_v10, %v1583_v21 }
  0x95   : > { %v1587_v22 = vpop.permute.xlu1 %324 }
  0x96   : > { %v415_v36 = vpop.permute.xlu0 %414  ;;  %v338_v21 = vmul.f32 %v1569_v10, %v1587_v22 }
  0x97   : > { %v488_v37 = vpop.permute.xlu2 %487  ;;  %v427_v38 = vmul.f32 %v415_v36, %v1569_v10  ;;  %v428_v39 = vmul.f32 %v415_v36, %v1571_v11 }
  0x98   : > { %v498_v40 = vmul.f32 %v488_v37, %v1569_v10  ;;  %v499_v42 = vmul.f32 %v488_v37, %v1571_v11 }
  0x9e   : > { %v354_v24 = vpop.permute.xlu1 %353 }
  0x9f   : > { %v362_v25 = vmul.f32 %v354_v24, %v1569_v10  ;;  %v363_v26 = vmul.f32 %v354_v24, %v1571_v11 }
  0xa0   : > { %v561_v41 = vpop.permute.xlu0 %560  ;;  %v557_v45 = vpop.permute.xlu2 %556 }
  0xa1   : > { %384 = vrot.lane.b32.xlu0 %v362_v25, %s1942_s13  ;;  %386 = vrot.lane.b32.xlu1 %v363_v26, %s1942_s13  ;;  %v569_v43 = vmul.f32 %v561_v41, %v1569_v10  ;;  %v570_v44 = vmul.f32 %v561_v41, %v1571_v11  ;;  %v567_v51 = vmul.f32 %v557_v45, %v1569_v10  ;;  %v616_v25 = vld [vmem:[%s1936_s2] sm:$0xff]  ;;  %v649_v26 = vld [vmem:[%s1937_s3 + $0x8] sm:$0xff]  ;;  %s1088_s13 = sshll.u32 %s1409_s27, 7 }
  0xa2   : > { %v568_v52 = vmul.f32 %v557_v45, %v1571_v11  ;;  %s1089_s23 = sadd.s32 4294967294, %s1088_s13  ;;  %s291_s13 = sand.u32 1, %s1401_s25  }
  0xa3   : > { %s983_s22 = scalar_lea.sflag [#allocation4], %s291_s13 }
  0xa7   : > { %v423_v29 = vpop.permute.xlu1 %422 }
  0xa8   : > { %v431_v30 = vmul.f32 %v423_v29, %v1569_v10  ;;  %v432_v31 = vmul.f32 %v423_v29, %v1571_v11  ;;  %v553_v50 = vpop.permute.xlu2 %552  ;;  %v549_v56 = vpop.permute.xlu0 %548 }
  0xa9   : > { %449 = vrot.lane.b32.xlu0 %v429_v28, %s1433_s16  ;;  %v565_v62 = vmul.f32 %v553_v50, %v1569_v10  ;;  %v566_v0 = vmul.f32 %v553_v50, %v1571_v11  ;;  %v563_v7 = vmul.f32 %v549_v56, %v1569_v10  ;;  %v564_v16 = vmul.f32 %v549_v56, %v1571_v11 }
  0xaa   : > { %453 = vrot.lane.b32.xlu1 %v431_v30, %s1433_s16  ;;  %455 = vrot.lane.b32.xlu2 %v432_v31, %s1433_s16 }
  0xb0   : > { %v492_v33 = vpop.permute.xlu1 %491 }
  0xb1   : > { %v500_v34 = vmul.f32 %v492_v33, %v1569_v10  ;;  %v501_v35 = vmul.f32 %v492_v33, %v1571_v11  ;;  %v310_v60 = vpop.permute.xlu0 %309  ;;  %v339_v33 = vmul.f32 %v1571_v11, %v1587_v22 }
  0xb2   : > { %451 = vrot.lane.b32.xlu1 %v430_v32, %s1433_s16  ;;  %v333_v1 = vmul.f32 %v1571_v11, %v310_v60  ;;  %v332_v4 = vmul.f32 %v1569_v10, %v310_v60 }
  0xb3   : > { %524 = vrot.lane.b32.xlu0 %v501_v35, %s1434_s17  ;;  %522 = vrot.lane.b32.xlu2 %v500_v34, %s1434_s17 }
  0xb8   : > { %v484_v46 = vpop.permute.xlu1 %483 }
  0xb9   : > { %v496_v49 = vmul.f32 %v484_v46, %v1569_v10  ;;  %v497_v53 = vmul.f32 %v484_v46, %v1571_v11  ;;  %v1650_v5 = vpop.permute.xlu0 %314 }
  0xba   : > { %445 = vrot.lane.b32.xlu1 %v427_v38, %s1433_s16  ;;  %v334_v17 = vmul.f32 %v1569_v10, %v1650_v5 }
  0xbb   : > { %518 = vrot.lane.b32.xlu0 %v498_v40, %s1434_s17  ;;  %447 = vrot.lane.b32.xlu2 %v428_v39, %s1433_s16 }
  0xc0   : > { %v480_v55 = vpop.permute.xlu1 %479 }
  0xc1   : > { %v494_v58 = vmul.f32 %v480_v55, %v1569_v10  ;;  %v495_v59 = vmul.f32 %v480_v55, %v1571_v11 }
  0xc2   : > { %520 = vrot.lane.b32.xlu1 %v499_v42, %s1434_s17 }
  0xc3   : > { %593 = vrot.lane.b32.xlu0 %v570_v44, %s1435_s18  ;;  %591 = vrot.lane.b32.xlu2 %v569_v43, %s1435_s18 }
  0xca   : > { %441 = vrot.lane.b32.xlu1 %v425_v47, %s1433_s16 }
  0xcb   : > { %514 = vrot.lane.b32.xlu0 %v496_v49, %s1434_s17  ;;  %443 = vrot.lane.b32.xlu2 %v426_v48, %s1433_s16 }
  0xd2   : > { %516 = vrot.lane.b32.xlu1 %v497_v53, %s1434_s17  ;;  %v373_v54 = vpop.permute.xlu2 %372 }
  0xd3   : > { %589 = vrot.lane.b32.xlu0 %v568_v52, %s1435_s18  ;;  %587 = vrot.lane.b32.xlu2 %v567_v51, %s1435_s18 }
  0xda   : > { %637 = vperm.xlu1 %1237, %v619_v57   ;;  %v377_v61 = vpop.permute.xlu2 %376 }
  0xdb   : > { %512 = vrot.lane.b32.xlu0 %v495_v59, %s1434_s17  ;;  %510 = vrot.lane.b32.xlu2 %v494_v58, %s1434_s17 }
  0xe2   : > { %583 = vrot.lane.b32.xlu1 %v565_v62, %s1435_s18  ;;  %v690_v62 = vlaneseq }
  0xe3   : > { %632 = vperm.xlu0 %1236, %v618_v63   ;;  %585 = vrot.lane.b32.xlu2 %v566_v0, %s1435_s18 }
  0xe9   : > { %v383_v8 = vpop.permute.xlu2 %382 }
  0xea   : > { %669 = vperm.xlu1 %1237, %v651_v2   ;;  %v1656_v9 = vadd.f32 %v383_v8, %v337_v3  ;;  %v375_v12 = vpop.permute.xlu1 %374  ;;  %v691_v2 = vand.u32 127, %v690_v62 }
  0xeb   : > { %664 = vperm.xlu0 %1236, %v650_v6   ;;  %579 = vrot.lane.b32.xlu2 %v563_v7, %s1435_s18  ;;  %v389_v13 = vsel %vm388_vm0, %v373_v54, %v375_v12  ;;  %v402_v14 = vadd.f32 %v375_v12, %v333_v1  ;;  %v335_v1 = vmul.f32 %v1571_v11, %v1650_v5 }
  0xec   : > { %v401_v15 = vadd.f32 %v389_v13, %v332_v4  ;;  %v692_v7 = vadd.s32 128, %v691_v2  ;;  %v693_v13 = vstv %s1089_s23 }
  0xf2   : > { %v379_v20 = vpop.permute.xlu0 %378  ;;  %581 = vrot.lane.b32.xlu1 %v564_v16, %s1435_s18  ;;  %v695_v16 = vadd.s32 %v693_v13, %v692_v7 }
  0xf3   : > { %v390_v23 = vsel %vm388_vm0, %v377_v61, %v379_v20  ;;  %654 = vperm.xlu0 %1236, %v648_v18   ;;  %627 = vperm.xlu2 %1238, %v617_v19   ;;  %v404_v3 = vadd.f32 %v379_v20, %v335_v1  ;;  %v694_v20 = vadd.s32 %v693_v13, %v691_v2 }
  0xf4   : > { %v1671_v24 = vadd.f32 %v390_v23, %v334_v17  ;;  %vm697_vm4 = vcmp.ge.s32.totalorder %v695_v16, 0  ;;  %vm699_vm5 = vcmp.lt.s32.totalorder %v695_v16, 256 }
  0xf5   : > { %vm1718_vm6 = vmand %vm697_vm4, %vm699_vm5  ;;  %vm696_vm8 = vcmp.ge.s32.totalorder %v694_v20, 0  ;;  %vm698_vm9 = vcmp.lt.s32.totalorder %v694_v20, 256 }
  0xf6   : > { %vm1724_vm10 = vmand %vm696_vm8, %vm698_vm9 }
  0xfa   : > { %622 = vperm.xlu1 %1237, %v616_v25  }
  0xfb   : > { %659 = vperm.xlu2 %1238, %v649_v26  }
 0x101   : > { %v381_v28 = vpop.permute.xlu1 %380 }
 0x102   : > { %v391_v29 = vsel %vm388_vm0, %v381_v28, %v383_v8 }
 0x103   : > { %v1682_v30 = vadd.f32 %v391_v29, %v336_v27 }
 0x104   : > { %v456_v31 = vpop.permute.xlu2 %455 }
 0x10d   : > { %v523_v32 = vpop.permute.xlu2 %522 }
 0x113   : > { %v385_v34 = vpop.permute.xlu0 %384  ;;  %v387_v35 = vpop.permute.xlu1 %386 }
 0x114   : > { %v408_v36 = vadd.f32 %v387_v35, %v339_v33  ;;  %v392_v39 = vsel %vm388_vm0, %v385_v34, %v387_v35 }
 0x115   : > { %v448_v37 = vpop.permute.xlu2 %447  ;;  %v407_v41 = vadd.f32 %v392_v39, %v338_v21 }
 0x116   : > { %v1686_v38 = vadd.f32 %v456_v31, %v408_v36  ;;  %v473_v4 = vadd.f32 %v448_v37, %v404_v3 }
 0x11b   : > { %v450_v40 = vpop.permute.xlu0 %449 }
 0x11c   : > { %v454_v42 = vpop.permute.xlu1 %453 }
 0x11d   : > { %v461_v43 = vsel %vm457_vm1, %v454_v42, %v456_v31  ;;  %v592_v44 = vpop.permute.xlu2 %591 }
 0x11e   : > { %v476_v45 = vadd.f32 %v461_v43, %v407_v41 }
 0x124   : > { %v452_v46 = vpop.permute.xlu1 %451 }
 0x125   : > { %v525_v47 = vpop.permute.xlu0 %524  ;;  %v444_v48 = vpop.permute.xlu2 %443  ;;  %v460_v18 = vsel %vm457_vm1, %v450_v40, %v452_v46  ;;  %v475_v28 = vadd.f32 %v452_v46, %v1656_v9 }
 0x126   : > { %v530_v49 = vsel %vm526_vm2, %v523_v32, %v525_v47  ;;  %v1693_v50 = vadd.f32 %v444_v48, %v402_v14  ;;  %v474_v27 = vadd.f32 %v460_v18, %v1682_v30 }
 0x127   : > { %v545_v51 = vadd.f32 %v530_v49, %v476_v45 }
 0x12c   : > { %v446_v52 = vpop.permute.xlu1 %445 }
 0x12d   : > { %v519_v10 = vpop.permute.xlu0 %518  ;;  %v588_v22 = vpop.permute.xlu2 %587 }
 0x134   : > { %v521_v53 = vpop.permute.xlu1 %520 }
 0x135   : > { %v594_v54 = vpop.permute.xlu0 %593  ;;  %v1695_v55 = vpop.permute.xlu2 %510  ;;  %v529_v19 = vsel %vm526_vm2, %v519_v10, %v521_v53 }
 0x136   : > { %v599_v33 = vsel %vm595_vm3, %v592_v44, %v594_v54  ;;  %v543_v36 = vadd.f32 %v529_v19, %v474_v27 }
 0x137   : > { %v614_v40 = vadd.f32 %v599_v33, %v545_v51  ;;  %v917_v33 = vld [vmem:[%s1939_s5 + $0x18] sm:$0xff] }
 0x13c   : > { %v442_v56 = vpop.permute.xlu1 %441 }
 0x13d   : > { %v458_v57 = vsel %vm457_vm1, %v442_v56, %v444_v48  ;;  %v515_v58 = vpop.permute.xlu0 %514  ;;  %v586_v59 = vpop.permute.xlu2 %585 }
 0x13e   : > { %v1698_v60 = vadd.f32 %v458_v57, %v401_v15  ;;  %v459_v15 = vsel %vm457_vm1, %v446_v52, %v448_v37  ;;  %v544_v37 = vadd.f32 %v521_v53, %v475_v28 }
 0x13f   : > { %v472_v11 = vadd.f32 %v459_v15, %v1671_v24  ;;  %v546_v24 = vadd.f32 %v525_v47, %v1686_v38 }
 0x141   : > { %v615_v41 = vadd.f32 %v594_v54, %v546_v24  ;;  %v942_v24 = vld [vmem:[%s1940_s6] sm:$0xff] }
 0x144   : > { %v517_v61 = vpop.permute.xlu1 %516 }
 0x145   : > { %v590_v63 = vpop.permute.xlu0 %589  ;;  %v1700_v0 = vpop.permute.xlu2 %579  ;;  %v542_v14 = vadd.f32 %v517_v61, %v473_v4  ;;  %v528_v17 = vsel %vm526_vm2, %v515_v58, %v517_v61 }
 0x146   : > { %v541_v23 = vadd.f32 %v528_v17, %v472_v11  ;;  %v598_v39 = vsel %vm595_vm3, %v588_v22, %v590_v63  ;;  %v613_v42 = vadd.f32 %v590_v63, %v544_v37  ;;  %v943_v37 = vld [vmem:[%s1940_s6 + $0x8] sm:$0xff] }
 0x147   : > { %v611_v5 = vadd.f32 %v586_v59, %v542_v14  ;;  %v612_v38 = vadd.f32 %v598_v39, %v543_v36  ;;  %v916_v36 = vld [vmem:[%s1939_s5 + $0x10] sm:$0xff] }
 0x14c   : > { %v638_v6 = vpop.permute.xlu1 %637 }
 0x14d   : > { %v1705_v8 = vpop.permute.xlu0 %512  ;;  %v628_v12 = vpop.permute.xlu2 %627  ;;  %v646_v45 = vmul.f32 %v638_v6, %v614_v40  ;;  %v647_v46 = vmul.f32 %v638_v6, %v615_v41 }
 0x14e   : > { %v643_v25 = vmul.f32 %v628_v12, %v611_v5  ;;  %v540_v15 = vadd.f32 %v1705_v8, %v1693_v50 }
 0x154   : > { %v584_v26 = vpop.permute.xlu1 %583 }
 0x155   : > { %v597_v29 = vsel %vm595_vm3, %v584_v26, %v586_v59  ;;  %v633_v31 = vpop.permute.xlu0 %632  ;;  %v660_v32 = vpop.permute.xlu2 %659 }
 0x156   : > { %v610_v34 = vadd.f32 %v597_v29, %v541_v23  ;;  %v675_v35 = vadd.f32 %v660_v32, %v643_v25  ;;  %v644_v48 = vmul.f32 %v633_v31, %v612_v38  ;;  %v645_v49 = vmul.f32 %v633_v31, %v613_v42  ;;  %v915_v31 = vld [vmem:[%s1939_s5 + $0x8] sm:$0xff] }
 0x158   : > { %v642_v9 = vmul.f32 %v628_v12, %v610_v34  ;;  %v683_v30 = vmax.f32 %v675_v35, 0.0  ;;  %v527_v12 = vsel %vm526_vm2, %v1695_v55, %v1705_v8  ;;  %v945_v34 = vld [vmem:[%s1940_s6 + $0x18] sm:$0xff]  ;;  %v944_v35 = vld [vmem:[%s1940_s6 + $0x10] sm:$0xff] }
 0x159   : > { %v539_v14 = vadd.f32 %v527_v12, %v1698_v60 }
 0x15a   : > { %v674_v43 = vadd.f32 %v660_v32, %v642_v9  ;;  %v709_v44 = vsel %vm1718_vm6, %v683_v30, 0.0  ;;  %v914_v32 = vld [vmem:[%s1939_s5] sm:$0xff] }
 0x15b   : > { %718 = vst.msk [vmem:[#allocation2 + $0x18] sm:$0xff] %vm715_vm7, %v709_v44 }
 0x15c   : > { %v1729_v52 = vmax.f32 %v674_v43, 0.0  ;;  %v670_v51 = vpop.permute.xlu1 %669 }
 0x15d   : > { %v678_v10 = vadd.f32 %v670_v51, %v646_v45  ;;  %v679_v22 = vadd.f32 %v670_v51, %v647_v46  ;;  %v665_v53 = vpop.permute.xlu0 %664 }
 0x15e   : > { %v708_v54 = vsel %vm1724_vm10, %v1729_v52, 0.0  ;;  %v676_v56 = vadd.f32 %v665_v53, %v644_v48  ;;  %v677_v57 = vadd.f32 %v665_v53, %v645_v49 }
 0x15f   : > { %v1734_v58 = vmax.f32 %v678_v10, 0.0  ;;  %v687_v59 = vmax.f32 %v679_v22, 0.0 }
 0x160   : > { %v1736_v61 = vmax.f32 %v676_v56, 0.0  ;;  %v685_v62 = vmax.f32 %v677_v57, 0.0 }
 0x161   : > { %v712_v63 = vsel %vm1724_vm10, %v1734_v58, 0.0  ;;  %v713_v1 = vsel %vm1718_vm6, %v687_v59, 0.0 }
 0x162   : > { %v710_v2 = vsel %vm1724_vm10, %v1736_v61, 0.0  ;;  %v711_v3 = vsel %vm1718_vm6, %v685_v62, 0.0  ;;  %v728_v4 = vld [vmem:[#allocation2 + $0x18] sm:$0xff]  ;;  %722 = vst.msk [vmem:[#allocation2 + $0x38] sm:$0xff] %vm715_vm7, %v713_v1 }
 0x163   : > { %v1249_v6 = vpack.i.bf16 %v728_v4, %v708_v54  ;;  %720 = vst.msk [vmem:[#allocation2 + $0x28] sm:$0xff] %vm715_vm7, %v711_v3 }
 0x164   : > { %v582_v7 = vpop.permute.xlu1 %581 }
 0x165   : > { %1250 = vrot.lane.b32.xlu0 %v1249_v6, %s1434_s17  ;;  %v596_v13 = vsel %vm595_vm3, %v1700_v0, %v582_v7  ;;  %v609_v18 = vadd.f32 %v582_v7, %v540_v15  ;;  %v655_v55 = vpop.permute.xlu0 %654 }
 0x166   : > { %v608_v17 = vadd.f32 %v596_v13, %v539_v14 }
 0x169   : > { %v730_v16 = vld [vmem:[#allocation2 + $0x38] sm:$0xff] }
 0x16a   : > { %v1239_v11 = vpack.i.bf16 %v730_v16, %v712_v63  ;;  %v729_v19 = vld [vmem:[#allocation2 + $0x28] sm:$0xff] }
 0x16b   : > { %v1244_v25 = vpack.i.bf16 %v729_v19, %v710_v2 }
 0x16c   : > { %v623_v5 = vpop.permute.xlu1 %622  ;;  %1240 = vrot.lane.b32.xlu1 %v1239_v11, %s1434_s17 }
 0x16d   : > { %v640_v20 = vmul.f32 %v623_v5, %v608_v17  ;;  %v641_v23 = vmul.f32 %v623_v5, %v609_v18  ;;  %1245 = vrot.lane.b32.xlu2 %v1244_v25, %s1434_s17  ;;  %1265 = vrot.lane.b32.xlu0 %v1244_v25, %s1433_s16 }
 0x16f   : > { %v672_v26 = vadd.f32 %v655_v55, %v640_v20  ;;  %v673_v27 = vadd.f32 %v655_v55, %v641_v23 }
 0x171   : > { %v1762_v60 = vmax.f32 %v672_v26, 0.0  ;;  %v681_v50 = vmax.f32 %v673_v27, 0.0 }
 0x173   : > { %v706_v0 = vsel %vm1724_vm10, %v1762_v60, 0.0  ;;  %v707_v8 = vsel %vm1718_vm6, %v681_v50, 0.0 }
 0x174   : > { %716 = vst.msk [vmem:[#allocation2 + $0x8] sm:$0xff] %vm715_vm7, %v707_v8 }
 0x175   : > { %1260 = vrot.lane.b32.xlu2 %v1239_v11, %s1433_s16  ;;  %1280 = vrot.lane.b32.xlu0 %v1239_v11, %s1435_s18 }
 0x17b   : > { %v727_v28 = vld [vmem:[#allocation2 + $0x8] sm:$0xff] }
 0x17c   : > { %v1274_v29 = vpack.i.bf16 %v727_v28, %v706_v0 }
 0x17d   : > { %1295 = vrot.lane.b32.xlu0 %v1244_v25, %s1952_s9 }
 0x17e   : > { %1275 = vrot.lane.b32.xlu2 %v1274_v29, %s1433_s16  ;;  %1255 = vrot.lane.b32.xlu1 %v1274_v29, %s1434_s17  ;;  %s1095_s17 = sshll.u32 %s1413_s28, 3  ;;  %s1351_s28 = scalar_lea.hbm %s1941_s7, 128 }
 0x185   : > { %1310 = vrot.lane.b32.xlu0 %v1274_v29, %s1435_s18 }
 0x186   : > { %1290 = vrot.lane.b32.xlu2 %v1244_v25, %s1435_s18  ;;  %1270 = vrot.lane.b32.xlu1 %v1249_v6, %s1433_s16  ;;  %s1085_s16 = sshll.u32 %s291_s13, 4 }
 0x187   : > { %s293_s20 = scalar_lea.vmem [#allocation3], %s1085_s16 }
 0x18d   : > { %925 = vperm.xlu0 %1236, %v915_v31  }
 0x18e   : > { %1305 = vrot.lane.b32.xlu2 %v1249_v6, %s1952_s9  ;;  %1285 = vrot.lane.b32.xlu1 %v1239_v11, %s1952_s9 }
 0x195   : > { %948 = vperm.xlu0 %1236, %v942_v24  }
 0x196   : > { %920 = vperm.xlu2 %1238, %v914_v32   ;;  %1300 = vrot.lane.b32.xlu1 %v1249_v6, %s1435_s18  ;;  %s993_s18 = sadd.s32 %s1409_s27, %s1095_s17  ;;  %s996_s27 = sshll.u32 %s293_s20, 4  ;;  %s997_s27 = int_to_ptr.vmem [resolvable:$true] %s996_s27 }
 0x19d   : > { %963 = vperm.xlu0 %1236, %v945_v34  }
 0x19e   : > { %935 = vperm.xlu2 %1238, %v917_v33   ;;  %1315 = vrot.lane.b32.xlu1 %v1274_v29, %s1952_s9  ;;  %s1096_s9 = sshll.u32 %s993_s18, 2 }
 0x19f   : > { %s995_s10 = scalar_lea.hbm %s1941_s7, %s1096_s9 }
 0x1a0   : > { %s998_s21 = sshll.u32 %s995_s10, 4  ;;  %s999_s21 = int_to_ptr.hbm [resolvable:$true] %s998_s21 }
 0x1a1   : > { %s1345_s17 = sshra.s32 %s999_s21, 4  ;;  %s1346_s17 = int_to_ptr.hbm [resolvable:$true] %s1345_s17 }
 0x1a2   : > { %s1347_s18 = scalar_lea.hbm %s1346_s17, 16  ;;  %p1352_p4 = scmp.lt.s32.totalorder %s1346_s17, %s1941_s7 }
 0x1a3   : > { %p1348_p0 = scmp.ne.s32.totalorder %s1346_s17, %s1347_s18  ;;  %p1353_p5 = scmp.lt.s32.totalorder %s1351_s28, %s1347_s18 }
 0x1a5   : > { %p1349_p1 = pnand %p1348_p0, %p1530_p3  ;;  %p1354_p6 = por %p1353_p5, %p1352_p4 }
 0x1a6   : > { %958 = vperm.xlu2 %1238, %v944_v35   ;;  %930 = vperm.xlu1 %1237, %v916_v36  }
 0x1a7   : > { %p1350_p2 = pneg %p1349_p1 }
 0x1a9   : > { %p1355_p7 = pnand %p1354_p6, %p1350_p2 }
 0x1ae   : > { %953 = vperm.xlu1 %1237, %v943_v37  }
 0x1c7   : > { %v1246_v39 = vpop.permute.xlu2 %1245 }
 0x1c8   : > { %v1248_v41 = vunpack.i.h.bf16 %v1246_v39  ;;  %v1247_v38 = vunpack.i.l.bf16 %v1246_v39  ;;  %v836_v39 = vld [vmem:[%s1938_s4 + $0x8] sm:$0xff] }
 0x1ca   : > { %v805_v49 = vsel %vm526_vm2, %v1247_v38, %v1248_v41  ;;  %v838_v38 = vld [vmem:[%s1938_s4 + $0x18] sm:$0xff] }
 0x1cf   : > { %v1261_v21 = vpop.permute.xlu2 %1260 }
 0x1d0   : > { %v1263_v1 = vunpack.i.h.bf16 %v1261_v21  ;;  %v1262_v2 = vunpack.i.l.bf16 %v1261_v21 }
 0x1d2   : > { %v782_v13 = vsel %vm457_vm1, %v1262_v2, %v1263_v1 }
 0x1d7   : > { %v1251_v9 = vpop.permute.xlu0 %1250 }
 0x1d8   : > { %v1276_v30 = vpop.permute.xlu2 %1275  ;;  %v1253_v45 = vunpack.i.h.bf16 %v1251_v9  ;;  %v1252_v46 = vunpack.i.l.bf16 %v1251_v9 }
 0x1d9   : > { %v1278_v16 = vunpack.i.h.bf16 %v1276_v30  ;;  %v1277_v17 = vunpack.i.l.bf16 %v1276_v30 }
 0x1da   : > { %v804_v51 = vsel %vm526_vm2, %v1252_v46, %v1253_v45 }
 0x1db   : > { %v779_v20 = vsel %vm457_vm1, %v1277_v17, %v1278_v16 }
 0x1de   : > { %v1241_v40 = vpop.permute.xlu1 %1240 }
 0x1df   : > { %v1243_v42 = vunpack.i.h.bf16 %v1241_v40  ;;  %v1242_v43 = vunpack.i.l.bf16 %v1241_v40  ;;  %v1266_v44 = vpop.permute.xlu0 %1265 }
 0x1e0   : > { %v1291_v10 = vpop.permute.xlu2 %1290  ;;  %v1268_v6 = vunpack.i.h.bf16 %v1266_v44  ;;  %v1267_v7 = vunpack.i.l.bf16 %v1266_v44  ;;  %v842_v44 = vld [vmem:[%s1938_s4 + $0x38] sm:$0xff] }
 0x1e1   : > { %v806_v48 = vsel %vm526_vm2, %v1242_v43, %v1243_v42  ;;  %v1293_v53 = vunpack.i.h.bf16 %v1291_v10  ;;  %v1292_v54 = vunpack.i.l.bf16 %v1291_v10  ;;  %v839_v42 = vld [vmem:[%s1938_s4 + $0x20] sm:$0xff]  ;;  %v841_v43 = vld [vmem:[%s1938_s4 + $0x30] sm:$0xff] }
 0x1e2   : > { %856 = vmatpush.msra.mxu0 %v806_v48  ;;  %1110 = vmatpush.msra.mxu2 %v806_v48  ;;  %v781_v14 = vsel %vm457_vm1, %v1267_v7, %v1268_v6 }
 0x1e3   : > { %1111 = vmatpush.msra.mxu3 %v806_v48  ;;  %v829_v62 = vsel %vm595_vm3, %v1292_v54, %v1293_v53 }
 0x1e4   : > { %857 = vmatpush.msra.mxu0 %v805_v49  ;;  %1112 = vmatpush.msra.mxu2 %v805_v49 }
 0x1e5   : > { %1113 = vmatpush.msra.mxu3 %v805_v49 }
 0x1e6   : > { %858 = vmatpush.msra.mxu0 %v804_v51  ;;  %1114 = vmatpush.msra.mxu2 %v804_v51 }
 0x1e7   : > { %1115 = vmatpush.msra.mxu3 %v804_v51  ;;  %v1281_v22 = vpop.permute.xlu0 %1280 }
 0x1e8   : > { %v1283_v56 = vunpack.i.h.bf16 %v1281_v22  ;;  %v1282_v57 = vunpack.i.l.bf16 %v1281_v22  ;;  %v1306_v23 = vpop.permute.xlu2 %1305 }
 0x1e9   : > { %v1308_v0 = vunpack.i.h.bf16 %v1306_v23  ;;  %v1307_v8 = vunpack.i.l.bf16 %v1306_v23 }
 0x1ea   : > { %v830_v59 = vsel %vm595_vm3, %v1282_v57, %v1283_v56 }
 0x1eb   : > { %897 = vmatpush.msra.mxu1 %v830_v59  ;;  %v756_v32 = vsel %vm388_vm0, %v1307_v8, %v1308_v0 }
 0x1ed   : > { %898 = vmatpush.msra.mxu1 %v829_v62 }
 0x1ef   : > { %v1296_v19 = vpop.permute.xlu0 %1295 }
 0x1f0   : > { %v1256_v63 = vpop.permute.xlu1 %1255  ;;  %v1298_v55 = vunpack.i.h.bf16 %v1296_v19  ;;  %v1297_v26 = vunpack.i.l.bf16 %v1296_v19  ;;  %v921_v45 = vpop.permute.xlu2 %920 }
 0x1f1   : > { %v1258_v3 = vunpack.i.h.bf16 %v1256_v63  ;;  %v1257_v4 = vunpack.i.l.bf16 %v1256_v63 }
 0x1f2   : > { %v757_v29 = vsel %vm388_vm0, %v1297_v26, %v1298_v55 }
 0x1f3   : > { %v803_v12 = vsel %vm526_vm2, %v1257_v4, %v1258_v3 }
 0x1f4   : > { %859 = vmatpush.msra.mxu0 %v803_v12  ;;  %1116 = vmatpush.msra.mxu2 %v803_v12 }
 0x1f5   : > { %1117 = vmatpush.msra.mxu3 %v803_v12 }
 0x1f6   : > { %860 = vmatpush.msra.mxu0 %v782_v13  ;;  %1118 = vmatpush.msra.mxu2 %v782_v13 }
 0x1f7   : > { %1119 = vmatpush.msra.mxu3 %v782_v13  ;;  %v1311_v31 = vpop.permute.xlu0 %1310 }
 0x1f8   : > { %v1271_v15 = vpop.permute.xlu1 %1270  ;;  %861 = vmatpush.msra.mxu0 %v781_v14  ;;  %1120 = vmatpush.msra.mxu2 %v781_v14  ;;  %v1313_v33 = vunpack.i.h.bf16 %v1311_v31  ;;  %v1312_v34 = vunpack.i.l.bf16 %v1311_v31  ;;  %v936_v22 = vpop.permute.xlu2 %935 }
 0x1f9   : > { %v1273_v18 = vunpack.i.h.bf16 %v1271_v15  ;;  %v1272_v11 = vunpack.i.l.bf16 %v1271_v15  ;;  %1121 = vmatpush.msra.mxu3 %v781_v14 }
 0x1fa   : > { %v827_v21 = vsel %vm595_vm3, %v1312_v34, %v1313_v33 }
 0x1fb   : > { %v780_v5 = vsel %vm457_vm1, %v1272_v11, %v1273_v18 }
 0x1fc   : > { %862 = vmatpush.msra.mxu0 %v780_v5  ;;  %1122 = vmatpush.msra.mxu2 %v780_v5 }
 0x1fd   : > { %1123 = vmatpush.msra.mxu3 %v780_v5 }
 0x1fe   : > { %863 = vmatpush.msra.mxu0 %v779_v20  ;;  %1124 = vmatpush.msra.mxu2 %v779_v20 }
 0x1ff   : > { %1125 = vmatpush.msra.mxu3 %v779_v20  ;;  %v926_v46 = vpop.permute.xlu0 %925 }
 0x200   : > { %v1286_v25 = vpop.permute.xlu1 %1285  ;;  %v959_v16 = vpop.permute.xlu2 %958 }
 0x201   : > { %v1288_v27 = vunpack.i.h.bf16 %v1286_v25  ;;  %v1287_v50 = vunpack.i.l.bf16 %v1286_v25 }
 0x203   : > { %v758_v28 = vsel %vm388_vm0, %v1287_v50, %v1288_v27 }
 0x204   : > { %864 = vmatpush.msra.mxu0 %v758_v28  ;;  %1126 = vmatpush.msra.mxu2 %v758_v28 }
 0x205   : > { %1127 = vmatpush.msra.mxu3 %v758_v28 }
 0x206   : > { %865 = vmatpush.msra.mxu0 %v757_v29  ;;  %1128 = vmatpush.msra.mxu2 %v757_v29 }
 0x207   : > { %1129 = vmatpush.msra.mxu3 %v757_v29  ;;  %v949_v59 = vpop.permute.xlu0 %948 }
 0x208   : > { %v1301_v24 = vpop.permute.xlu1 %1300  ;;  %866 = vmatpush.msra.mxu0 %v756_v32  ;;  %1130 = vmatpush.msra.mxu2 %v756_v32 }
 0x209   : > { %v1303_v35 = vunpack.i.h.bf16 %v1301_v24  ;;  %v1302_v36 = vunpack.i.l.bf16 %v1301_v24  ;;  %1131 = vmatpush.msra.mxu3 %v756_v32 }
 0x20b   : > { %v828_v37 = vsel %vm595_vm3, %v1302_v36, %v1303_v35 }
 0x20c   : > { %899 = vmatpush.msra.mxu1 %v828_v37 }
 0x20e   : > { %900 = vmatpush.msra.mxu1 %v827_v21 }
 0x20f   : > { %1090 = vmatmul.msk.f32.vlgmr.msra.gmra.mxu1 %vm843_vm11, %v836_v39  ;;  %v964_v11 = vpop.permute.xlu0 %963 }
 0x210   : > { %v1316_v9 = vpop.permute.xlu1 %1315 }
 0x211   : > { %v1318_v30 = vunpack.i.h.bf16 %v1316_v9  ;;  %v1317_v40 = vunpack.i.l.bf16 %v1316_v9 }
 0x213   : > { %v755_v41 = vsel %vm388_vm0, %v1317_v40, %v1318_v30 }
 0x214   : > { %867 = vmatpush.msra.mxu0 %v755_v41  ;;  %1132 = vmatpush.msra.mxu2 %v755_v41 }
 0x215   : > { %1133 = vmatpush.msra.mxu3 %v755_v41 }
 0x216   : > { %1319 = vmatpush.msk.msra.mxu0 %vm1724_vm10, %v1734_v58  ;;  %1320 = vmatpush.msk.msra.mxu2 %vm1724_vm10, %v1734_v58 }
 0x217   : > { %1321 = vmatpush.msk.msra.mxu3 %vm1724_vm10, %v1734_v58  ;;  %1091 = vmatmul.msk.f32.gmra.mxu1 %vm843_vm11, %v838_v38  ;;  %v835_v58 = vld [vmem:[%s1938_s4] sm:$0xff] }
 0x218   : > { %1322 = vmatpush.msk.msra.mxu0 %vm1724_vm10, %v1736_v61  ;;  %1323 = vmatpush.msk.msra.mxu2 %vm1724_vm10, %v1736_v61  ;;  %v931_v49 = vpop.permute.xlu1 %930 }
 0x219   : > { %1324 = vmatpush.msk.msra.mxu3 %vm1724_vm10, %v1736_v61  ;;  %v837_v61 = vld [vmem:[%s1938_s4 + $0x10] sm:$0xff] }
 0x21a   : > { %1325 = vmatpush.msk.msra.mxu0 %vm1724_vm10, %v1729_v52  ;;  %1326 = vmatpush.msk.msra.mxu2 %vm1724_vm10, %v1729_v52 }
 0x21b   : > { %1327 = vmatpush.msk.msra.mxu3 %vm1724_vm10, %v1729_v52  ;;  %v840_v52 = vld [vmem:[%s1938_s4 + $0x28] sm:$0xff] }
 0x21c   : > { %1328 = vmatpush.msk.msra.mxu0 %vm1724_vm10, %v1762_v60  ;;  %1329 = vmatpush.msk.msra.mxu2 %vm1724_vm10, %v1762_v60 }
 0x21d   : > { %1330 = vmatpush.msk.msra.mxu3 %vm1724_vm10, %v1762_v60  ;;  %872 = vmatmul.f32.vlgmr.msra.gmra.mxu0 %v835_v58 }
 0x21e   : > { %875 = vmatmul.f32.vlgmr.msra.gmra.mxu2 %v837_v61  ;;  %878 = vmatmul.f32.vlgmr.msra.gmra.mxu3 %v839_v42 }
 0x21f   : > { %1092 = vmatmul.msk.f32.gmra.mxu1 %vm843_vm11, %v840_v52 }
 0x220   : > { %v954_v2 = vpop.permute.xlu1 %953 }
 0x226   : > { %881 = vmatmul.f32.gmra.mxu3 %v841_v43 }
 0x227   : > { %1093 = vmatmul.msk.f32.gmra.mxu1 %vm843_vm11, %v842_v44 }
 0x28c   : > { %v902_v47 = vpop.f32.mrf.mxu1 }
 0x294   : > { %v905_v60 = vpop.f32.mrf.mxu1 }
 0x29a   : > { %v873_v48 = vpop.f32.mrf.mxu0 }
 0x29b   : > { %v903_v51 = vadd.f32 %v902_v47, %v873_v48 }
 0x29c   : > { %v908_v10 = vpop.f32.mrf.mxu1 }
 0x29d   : > { %v938_v53 = vmul.f32 %v921_v45, %v903_v51 }
 0x29f   : > { %v966_v62 = vadd.f32 %v949_v59, %v938_v53 }
 0x2a1   : > { %v876_v54 = vpop.f32.mrf.mxu2  ;;  %v879_v56 = vpop.f32.mrf.mxu3  ;;  %v970_v6 = vmax.f32 %v966_v62, 0.0 }
 0x2a2   : > { %v906_v57 = vadd.f32 %v905_v60, %v876_v54  ;;  %v909_v1 = vadd.f32 %v908_v10, %v879_v56 }
 0x2a4   : > { %v939_v63 = vmul.f32 %v926_v46, %v906_v57  ;;  %v911_v4 = vpop.f32.mrf.mxu1  ;;  %v940_v12 = vmul.f32 %v931_v49, %v909_v1 }
 0x2a6   : > { %v967_v3 = vadd.f32 %v954_v2, %v939_v63  ;;  %v968_v17 = vadd.f32 %v959_v16, %v940_v12 }
 0x2a8   : > { %v971_v7 = vmax.f32 %v967_v3, 0.0  ;;  %v972_v19 = vmax.f32 %v968_v17, 0.0 }
 0x2a9   : > { %v882_v13 = vpop.f32.mrf.mxu3 }
 0x2aa   : > { %v1102_v14 = vpack.c.bf16 %v971_v7, %v970_v6  ;;  %v912_v15 = vadd.f32 %v911_v4, %v882_v13 }
 0x2ac   : > { %1103 = vst [vmem:[%s293_s20] sm:$0xff] %v1102_v14   ;;  %v941_v18 = vmul.f32 %v936_v22, %v912_v15 }
 0x2ae   : > { %v969_v5 = vadd.f32 %v964_v11, %v941_v18 }
 0x2b0   : > { %v973_v20 = vmax.f32 %v969_v5, 0.0 }
 0x2b2   : > { %v1107_v23 = vpack.c.bf16 %v973_v20, %v972_v19 }
 0x2b4   : > { %1109 = vst [vmem:[%s293_s20 + $0x8] sm:$0xff] %v1107_v23  }
 0x2b5   : > { %1358 = shalt.err (!%p1355_p7)
}
 0x2b6   : > { %s1436_s13 = smov 64   ;;  %s1437_s20 = smov 128  }
 0x2b7   : > { %s1438_s0 = smov 4  }
 0x2b8   : > { %1142 = dma.vmem_to_hbm [thread:$0]  (%p1530_p3), %s997_s27, 256, %s999_s21, %s983_s22, %s1436_s13, %s1437_s20, %s1438_s0  }
 0x2b9 PF: > { %p1148_p9 = scmp.ge.s32.totalorder %s1425_s8, 2  ;;  %s1013_s16 = sand.u32 1, %s1397_s24  }
 0x2ba   : > { %s1014_s17 = scalar_lea.sflag [#allocation4], %s1013_s16 }
 0x2bb   : > { %p1145_p10 = pnand %p1148_p9, %p1539_p8 }
 0x2bd   : > { %p1146_p11 = pneg %p1145_p10 }
 0x2bf   : > { %1392 = dma.done.wait (%p1146_p11), %s1014_s17, 256  }
 0x2c0   : > { %1394 = vsyncadd (%p1146_p11), %s1014_s17, 4294967040  ;;  %s20_s8 = sadd.s32 1, %s1425_s8   ;;  %s1953_s24 = smov %s1401_s25 }
 0x2c1   : > { %p17_p12 = scmp.ge.s32.totalorder %s20_s8, 10   ;;  %s1954_s25 = smov %s1405_s26 }
 0x2c2   : > { %s1955_s26 = smov %s1548_s19  ;;  %s1956_s27 = smov %s1417_s29 }
 0x2c3   : > { %s1957_s28 = smov %s1421_s30  ;;  %s1958_s29 = smov %s1961_s11 }
 0x2c4   : > { %s1959_s30 = smov %s1965_s12  ;;  %19 = sbr.rel (!%p17_p12) target bundleno = 7 (0x7), region = 83 }
 0x2c9   :  { %1020 = vsyncpa [#allocation4], 1 }
 0x2ca   :  { %1022 = vsyncpa [#allocation4 + $0x1], 1 }

</bundles_post_ra>
